<compile_context>
chip_gen: v7x
topology: tpu7x:2x2x1
jax: 0.10.0
libtpu: 0.0.40
codegen_flags: <defaults>
</compile_context>

<pallas_src>
import functools
from math import sqrt

import jax
import jax.numpy as jnp
from jax import lax
from jax.experimental import pallas as pl
from jax.experimental.pallas import tpu as pltpu


def _round_up(x, m):
    return ((x + m - 1) // m) * m


def _vmem_capacity_bytes():
    try:
        return int(pltpu.get_tpu_info().vmem_capacity_bytes)
    except Exception:
        return 64 * 1024 * 1024  # conservative fallback: v7x per-TC VMEM


def _usage_bytes(tq, tk, dim, H, rank, lk_pad, in_bytes, out_bytes):
    """Rough per-step VMEM footprint (double-buffered blocks + temporaries)."""
    return (2 * tq * H * lk_pad * out_bytes       # output block (dominant term)
            + 2 * dim * tq * in_bytes             # Y block
            + 2 * dim * tk * in_bytes             # X block
            + 4 * H * rank * dim * in_bytes       # Q, K (resident, 2 buffers each)
            + H * rank * (tq + tk) * 4            # qy scratch + kx temp (f32)
            + 2 * tq * tk * 4)                    # per-head score temp + slack


def _pick_tiles(Lq, lk_pad, dim, H, rank, in_bytes, out_bytes, budget):
    """Largest (q_tile, k_tile) whose footprint fits `budget`.

    Prefers a large q tile (amortizes per-step overhead, fewer X re-reads),
    then the largest k tile (keep X fully resident across q tiles if possible).
    """
    usage = functools.partial(_usage_bytes, dim=dim, H=H, rank=rank,
                              lk_pad=lk_pad, in_bytes=in_bytes,
                              out_bytes=out_bytes)
    q_cands = [Lq] + list(range(min(_round_up(Lq, 128), 1024), 127, -128))
    k_cands = [lk_pad] + [t for t in range(lk_pad - 128, 127, -128)
                          if lk_pad % t == 0]
    for tq in q_cands:
        for tk in k_cands:
            if usage(tq, tk) <= budget:
                return tq, tk
    return min(Lq, 128), 128  # smallest sensible tiles


def _inside_heads_kernel(y_ref, x_ref, q_ref, k_ref, o_ref, qy_sc, *,
                         nheads, lk_pad, k_tile, compute_dtype):
    # y_ref: (1, dim, tq)       x_ref: (1, dim, tk)
    # q_ref/k_ref: (H, rank, dim) -- resident across the whole grid
    # o_ref: (1, tq, H*lk_pad) lane-dense output slab, resident across kt
    # qy_sc: (H, rank, tq) f32 scratch, valid for the current (b, q-tile)
    kt = pl.program_id(2)

    @pl.when(kt == 0)
    def _():
        # Fused head query projections: (H, rank, dim) x (dim, tq) -> (H, rank, tq).
        # 1/sqrt(rank) is already folded into Q by the wrapper.
        qy_sc[...] = lax.dot_general(
            q_ref[...], y_ref[0], (((2,), (0,)), ((), ())),
            preferred_element_type=jnp.float32)

    # Fused head key projections for this key tile: (H, rank, tk).
    kx = lax.dot_general(
        k_ref[...], x_ref[0], (((2,), (0,)), ((), ())),
        preferred_element_type=jnp.float32)

    # Casts hoisted out of the per-head loop (no-ops when compute_dtype is f32).
    qy = qy_sc[...].astype(compute_dtype)
    kx = kx.astype(compute_dtype)

    base = kt * k_tile
    for h in range(nheads):  # small static H -> unrolled; slices are static
        s_h = lax.dot_general(qy[h], kx[h], (((0,), (0,)), ((), ())),
                              preferred_element_type=jnp.float32)  # [tq, tk]
        off = pl.multiple_of(h * lk_pad + base, 128)  # 128-aligned -> unmasked vst
        o_ref[0, :, pl.ds(off, k_tile)] = s_h.astype(o_ref.dtype)
    # TODO(synk): for large nheads switch to lax.fori_loop(..., unroll=k) to
    # bound live [tq, tk] temporaries.


def inside_heads(X, Y, Q, K, *, compute_dtype=jnp.float32, out_dtype=None,
                 q_tile=None, k_tile=None, vmem_budget_bytes=None):
    """Pallas equivalent of torch einsum('bdq,hrd,hre,bek->bqhk', Y, Q, K, X)/sqrt(r).

    X: [B, dim, Lk] ('bek'), Y: [B, dim, Lq] ('bdq'), Q/K: [H, rank, dim].
    Returns [B, Lq, H, Lk] in `out_dtype` (default: X.dtype).

    The kernel is output-write-bound (AI ~ rank/2 FLOP/byte); on v6e/v7x use
    compute_dtype=out_dtype=jnp.bfloat16 to halve HBM write traffic and the
    VMEM output double buffer.  On v5e keep f32 elementwise (no bf16 VPU).
    """
    B, dim, Lk = X.shape
    Bq, dimq, Lq = Y.shape
    H, rank, dimw = Q.shape
    assert (B, dim) == (Bq, dimq) and dim == dimw and K.shape == (H, rank, dim)

    if out_dtype is None:
        out_dtype = X.dtype
    in_bytes = jnp.dtype(compute_dtype).itemsize
    out_bytes = jnp.dtype(out_dtype).itemsize

    # Fold 1/sqrt(rank) into the tiny Q parameter; cast everything to the MXU
    # compute dtype once here (not per grid step inside the kernel).
    Qs = (Q.astype(jnp.float32) * (1.0 / sqrt(rank))).astype(compute_dtype)
    Ks = K.astype(compute_dtype)
    Xc = X.astype(compute_dtype)
    Yc = Y.astype(compute_dtype)

    # Pad keys to a 128-lane multiple so every head stripe store is lane-dense;
    # padded columns are sliced away after the call.
    lk_pad = max(_round_up(Lk, 128), 128)
    if lk_pad != Lk:
        Xc = jnp.pad(Xc, ((0, 0), (0, 0), (0, lk_pad - Lk)))

    # VMEM-aware tile selection + explicit scoped-VMEM limit.
    capacity = _vmem_capacity_bytes()
    vmem_limit = int(capacity * 3 // 4)  # headroom for Mosaic internal scratch
    budget = (vmem_budget_bytes if vmem_budget_bytes is not None
              else int(capacity * 0.55))
    auto_tq, auto_tk = _pick_tiles(Lq, lk_pad, dim, H, rank,
                                   in_bytes, out_bytes, budget)
    tq = q_tile if q_tile is not None else auto_tq
    tk = k_tile if k_tile is not None else auto_tk
    assert lk_pad % tk == 0, "k_tile must divide the padded key length"

    # Pad queries to a multiple of the q tile (padded rows sliced away later).
    lq_pad = _round_up(Lq, tq)
    if lq_pad != Lq:
        Yc = jnp.pad(Yc, ((0, 0), (0, 0), (0, lq_pad - Lq)))

    grid = (B, lq_pad // tq, lk_pad // tk)

    kernel = functools.partial(
        _inside_heads_kernel, nheads=H, lk_pad=lk_pad, k_tile=tk,
        compute_dtype=compute_dtype)

    out_flat = pl.pallas_call(
        kernel,
        out_shape=jax.ShapeDtypeStruct((B, lq_pad, H * lk_pad), out_dtype),
        grid_spec=pltpu.PrefetchScalarGridSpec(
            num_scalar_prefetch=0,
            grid=grid,
            in_specs=[
                pl.BlockSpec((1, dim, tq), lambda b, qt, kt: (b, 0, qt)),   # Y tile
                pl.BlockSpec((1, dim, tk), lambda b, qt, kt: (b, 0, kt)),   # X k-tile
                pl.BlockSpec((H, rank, dim), lambda b, qt, kt: (0, 0, 0)),  # Q resident
                pl.BlockSpec((H, rank, dim), lambda b, qt, kt: (0, 0, 0)),  # K resident
            ],
            # Output slab resident in VMEM across kt; one HBM writeback per (b, q-tile).
            out_specs=pl.BlockSpec((1, tq, H * lk_pad),
                                   lambda b, qt, kt: (b, qt, 0)),
            scratch_shapes=[pltpu.VMEM((H, rank, tq), jnp.float32)],
        ),
        compiler_params=pltpu.CompilerParams(
            # B leads so the v7x 2-TC megacore split lands on batch.
            dimension_semantics=("parallel", "parallel", "arbitrary"),
            vmem_limit_bytes=vmem_limit,
        ),
    )(Yc, Xc, Qs, Ks)

    # Free contiguous reshape, then slice away the Lq/Lk padding.
    out = out_flat.reshape(B, lq_pad, H, lk_pad)
    return out[:, :Lq, :, :Lk]


def init_params(key, dim, rank, nheads, dtype=jnp.float32):
    """Deterministic Xavier-uniform init matching the torch module."""
    qk_a = sqrt(6.0 / (rank + dim))
    vo_a = sqrt(6.0 / (nheads * dim + dim))
    kq, kk, kv = jax.random.split(key, 3)
    Q = jax.random.uniform(kq, (nheads, rank, dim), dtype, -qk_a, qk_a)
    K = jax.random.uniform(kk, (nheads, rank, dim), dtype, -qk_a, qk_a)
    VO = jax.random.uniform(kv, (nheads, dim, dim), dtype, -vo_a, vo_a)
    return Q, K, VO


def assemble_QK(Q, K, head_ix):
    # Q[h].T @ K[h] : [dim, dim]  (plain-JAX glue, mirrors the torch method)
    return Q[head_ix].T @ K[head_ix]


def assemble_VO(VO, head_ix):
    return VO[head_ix]


if __name__ == "__main__":
    key = jax.random.PRNGKey(0)

    # --- Case 1: tiny shapes, f32 (tight check vs the einsum reference) ------
    dim, rank, nheads = 32, 8, 4
    B, Lq, Lk = 2, 8, 8
    kp, kx, ky = jax.random.split(key, 3)
    Q, K, VO = init_params(kp, dim, rank, nheads)
    X = jax.random.normal(kx, (B, dim, Lk), jnp.float32)   # 'bek'
    Y = jax.random.normal(ky, (B, dim, Lq), jnp.float32)   # 'bdq'

    out = jax.block_until_ready(inside_heads(X, Y, Q, K))
    ref = jnp.einsum('bdq,hrd,hre,bek->bqhk', Y, Q, K, X) / sqrt(rank)
    assert out.shape == (B, Lq, nheads, Lk)
    assert jnp.allclose(out, ref, atol=1e-4, rtol=1e-4)

    # --- Case 2: bf16 compute + bf16 output (HBM-write-bound fast path) ------
    out_bf16 = jax.block_until_ready(
        inside_heads(X, Y, Q, K, compute_dtype=jnp.bfloat16,
                     out_dtype=jnp.bfloat16))
    assert out_bf16.dtype == jnp.bfloat16
    assert jnp.allclose(out_bf16.astype(jnp.float32), ref, atol=0.25, rtol=0.1)

    # --- Case 3: forced q/k tiling (exercises kt axis + resident output slab)
    dim2, rank2, nheads2 = 128, 16, 4
    B2, Lq2, Lk2 = 1, 256, 256
    kp2, kx2, ky2 = jax.random.split(jax.random.PRNGKey(1), 3)
    Q2, K2, _ = init_params(kp2, dim2, rank2, nheads2)
    X2 = jax.random.normal(kx2, (B2, dim2, Lk2), jnp.float32)
    Y2 = jax.random.normal(ky2, (B2, dim2, Lq2), jnp.float32)
    out2 = jax.block_until_ready(
        inside_heads(X2, Y2, Q2, K2, q_tile=128, k_tile=128))
    ref2 = jnp.einsum('bdq,hrd,hre,bek->bqhk', Y2, Q2, K2, X2) / sqrt(rank2)
    assert out2.shape == (B2, Lq2, nheads2, Lk2)
    assert jnp.allclose(out2, ref2, atol=2e-3, rtol=2e-3)

    print("KERNEL_OK")
</pallas_src>

<mosaic_0001>
module attributes {stable_mosaic.version = 11 : i64} {
  func.func @_inside_heads_kernel(%arg0: i32, %arg1: i32, %arg2: i32, %arg3: memref<1x32x8xf32, #tpu.memory_space<vmem>>, %arg4: memref<1x32x128xf32, #tpu.memory_space<vmem>>, %arg5: memref<4x8x32xf32, #tpu.memory_space<vmem>>, %arg6: memref<4x8x32xf32, #tpu.memory_space<vmem>>, %arg7: memref<1x8x512xf32, #tpu.memory_space<vmem>>, %arg8: memref<4x8x8xf32, #tpu.memory_space<vmem>>) attributes {dimension_semantics = [#tpu.dimension_semantics<parallel>, #tpu.dimension_semantics<parallel>, #tpu.dimension_semantics<arbitrary>], iteration_bounds = array<i64: 2, 1, 1>, scalar_prefetch = 0 : i64, scratch_operands = 1 : i64, tpu.core_type = #tpu.core_type<tc>, window_params = [{transform_indices = @transform_0, window_bounds = array<i64: 1, 32, 8>}, {transform_indices = @transform_1, window_bounds = array<i64: 1, 32, 128>}, {pipeline_mode = #tpu.pipeline_mode<synchronous>, transform_indices = @transform_2, window_bounds = array<i64: 4, 8, 32>}, {pipeline_mode = #tpu.pipeline_mode<synchronous>, transform_indices = @transform_3, window_bounds = array<i64: 4, 8, 32>}, {transform_indices = @transform_4, window_bounds = array<i64: 1, 8, 512>}]} {
    %c0_i32 = arith.constant 0 : i32
    %0 = arith.cmpi eq, %arg2, %c0_i32 : i32
    %1 = arith.extui %0 : i1 to i32
    %c0_i32_0 = arith.constant 0 : i32
    %2 = arith.cmpi ne, %1, %c0_i32_0 : i32
    scf.if %2 {
      %c0_23 = arith.constant 0 : index
      %c0_24 = arith.constant 0 : index
      %c0_25 = arith.constant 0 : index
      %53 = vector.load %arg5[%c0_23, %c0_24, %c0_25] : memref<4x8x32xf32, #tpu.memory_space<vmem>>, vector<4x8x32xf32>
      %c0_26 = arith.constant 0 : index
      %c0_27 = arith.constant 0 : index
      %c0_28 = arith.constant 0 : index
      %54 = vector.load %arg3[%c0_26, %c0_27, %c0_28] : memref<1x32x8xf32, #tpu.memory_space<vmem>>, vector<1x32x8xf32>
      %55 = vector.shape_cast %54 : vector<1x32x8xf32> to vector<32x8xf32>
      %cst_29 = arith.constant dense<0.000000e+00> : vector<4x8x8xf32>
      %56 = tpu.matmul %53, %55, %cst_29 {dimension_numbers = #tpu.dot_dimension_numbers<[2], [0], [0, 1], [1], [0, 0, 0, 1, 1, 1], [], []>} : vector<4x8x32xf32>, vector<32x8xf32>, vector<4x8x8xf32> -> vector<4x8x8xf32>
      %c0_30 = arith.constant 0 : index
      %c0_31 = arith.constant 0 : index
      %c0_32 = arith.constant 0 : index
      %57 = vector.load %arg8[%c0_30, %c0_31, %c0_32] : memref<4x8x8xf32, #tpu.memory_space<vmem>>, vector<4x8x8xf32>
      tpu.vector_store %arg8[%c0_30, %c0_31, %c0_32], %56 {strides = array<i32>} : memref<4x8x8xf32, #tpu.memory_space<vmem>>, vector<4x8x8xf32>,
    } else {
    }
    %c0 = arith.constant 0 : index
    %c0_1 = arith.constant 0 : index
    %c0_2 = arith.constant 0 : index
    %3 = vector.load %arg6[%c0, %c0_1, %c0_2] : memref<4x8x32xf32, #tpu.memory_space<vmem>>, vector<4x8x32xf32>
    %c0_3 = arith.constant 0 : index
    %c0_4 = arith.constant 0 : index
    %c0_5 = arith.constant 0 : index
    %4 = vector.load %arg4[%c0_3, %c0_4, %c0_5] : memref<1x32x128xf32, #tpu.memory_space<vmem>>, vector<1x32x128xf32>
    %5 = vector.shape_cast %4 : vector<1x32x128xf32> to vector<32x128xf32>
    %cst = arith.constant dense<0.000000e+00> : vector<4x8x128xf32>
    %6 = tpu.matmul %3, %5, %cst {dimension_numbers = #tpu.dot_dimension_numbers<[2], [0], [0, 1], [1], [0, 0, 0, 1, 1, 1], [], []>} : vector<4x8x32xf32>, vector<32x128xf32>, vector<4x8x128xf32> -> vector<4x8x128xf32>
    %c0_6 = arith.constant 0 : index
    %c0_7 = arith.constant 0 : index
    %c0_8 = arith.constant 0 : index
    %7 = vector.load %arg8[%c0_6, %c0_7, %c0_8] : memref<4x8x8xf32, #tpu.memory_space<vmem>>, vector<4x8x8xf32>
    %c128_i32 = arith.constant 128 : i32
    %8 = arith.muli %arg2, %c128_i32 : i32
    %9 = vector.extract_strided_slice %7 {offsets = [0, 0, 0], sizes = [1, 8, 8], strides = [1, 1, 1]} : vector<4x8x8xf32> to vector<1x8x8xf32>
    %10 = vector.shape_cast %9 : vector<1x8x8xf32> to vector<8x8xf32>
    %11 = vector.extract_strided_slice %6 {offsets = [0, 0, 0], sizes = [1, 8, 128], strides = [1, 1, 1]} : vector<4x8x128xf32> to vector<1x8x128xf32>
    %12 = vector.shape_cast %11 : vector<1x8x128xf32> to vector<8x128xf32>
    %cst_9 = arith.constant dense<0.000000e+00> : vector<8x128xf32>
    %13 = tpu.matmul %10, %12, %cst_9 {dimension_numbers = #tpu.dot_dimension_numbers<[0], [0], [1], [1], [0, 1, 1, 1], [], []>} : vector<8x8xf32>, vector<8x128xf32>, vector<8x128xf32> -> vector<8x128xf32>
    %c0_i32_10 = arith.constant 0 : i32
    %14 = arith.addi %c0_i32_10, %8 : i32
    %15 = tpu.assume_multiple %14, 128 : i32
    %c0_11 = arith.constant 0 : index
    %c0_12 = arith.constant 0 : index
    %16 = arith.index_cast %15 : i32 to index
    %17 = vector.load %arg7[%c0_11, %c0_12, %16] : memref<1x8x512xf32, #tpu.memory_space<vmem>>, vector<1x8x128xf32>
    %18 = vector.shape_cast %17 : vector<1x8x128xf32> to vector<8x128xf32>
    %19 = vector.shape_cast %13 : vector<8x128xf32> to vector<1x8x128xf32>
    tpu.vector_store %arg7[%c0_11, %c0_12, %16], %19 {strides = array<i32>} : memref<1x8x512xf32, #tpu.memory_space<vmem>>, vector<1x8x128xf32>,
    %20 = vector.extract_strided_slice %7 {offsets = [1, 0, 0], sizes = [1, 8, 8], strides = [1, 1, 1]} : vector<4x8x8xf32> to vector<1x8x8xf32>
    %21 = vector.shape_cast %20 : vector<1x8x8xf32> to vector<8x8xf32>
    %22 = vector.extract_strided_slice %6 {offsets = [1, 0, 0], sizes = [1, 8, 128], strides = [1, 1, 1]} : vector<4x8x128xf32> to vector<1x8x128xf32>
    %23 = vector.shape_cast %22 : vector<1x8x128xf32> to vector<8x128xf32>
    %cst_13 = arith.constant dense<0.000000e+00> : vector<8x128xf32>
    %24 = tpu.matmul %21, %23, %cst_13 {dimension_numbers = #tpu.dot_dimension_numbers<[0], [0], [1], [1], [0, 1, 1, 1], [], []>} : vector<8x8xf32>, vector<8x128xf32>, vector<8x128xf32> -> vector<8x128xf32>
    %c128_i32_14 = arith.constant 128 : i32
    %25 = arith.addi %c128_i32_14, %8 : i32
    %26 = tpu.assume_multiple %25, 128 : i32
    %c0_15 = arith.constant 0 : index
    %c0_16 = arith.constant 0 : index
    %27 = arith.index_cast %26 : i32 to index
    %28 = vector.load %arg7[%c0_15, %c0_16, %27] : memref<1x8x512xf32, #tpu.memory_space<vmem>>, vector<1x8x128xf32>
    %29 = vector.shape_cast %28 : vector<1x8x128xf32> to vector<8x128xf32>
    %30 = vector.shape_cast %24 : vector<8x128xf32> to vector<1x8x128xf32>
    tpu.vector_store %arg7[%c0_15, %c0_16, %27], %30 {strides = array<i32>} : memref<1x8x512xf32, #tpu.memory_space<vmem>>, vector<1x8x128xf32>,
    %31 = vector.extract_strided_slice %7 {offsets = [2, 0, 0], sizes = [1, 8, 8], strides = [1, 1, 1]} : vector<4x8x8xf32> to vector<1x8x8xf32>
    %32 = vector.shape_cast %31 : vector<1x8x8xf32> to vector<8x8xf32>
    %33 = vector.extract_strided_slice %6 {offsets = [2, 0, 0], sizes = [1, 8, 128], strides = [1, 1, 1]} : vector<4x8x128xf32> to vector<1x8x128xf32>
    %34 = vector.shape_cast %33 : vector<1x8x128xf32> to vector<8x128xf32>
    %cst_17 = arith.constant dense<0.000000e+00> : vector<8x128xf32>
    %35 = tpu.matmul %32, %34, %cst_17 {dimension_numbers = #tpu.dot_dimension_numbers<[0], [0], [1], [1], [0, 1, 1, 1], [], []>} : vector<8x8xf32>, vector<8x128xf32>, vector<8x128xf32> -> vector<8x128xf32>
    %c256_i32 = arith.constant 256 : i32
    %36 = arith.addi %c256_i32, %8 : i32
    %37 = tpu.assume_multiple %36, 128 : i32
    %c0_18 = arith.constant 0 : index
    %c0_19 = arith.constant 0 : index
    %38 = arith.index_cast %37 : i32 to index
    %39 = vector.load %arg7[%c0_18, %c0_19, %38] : memref<1x8x512xf32, #tpu.memory_space<vmem>>, vector<1x8x128xf32>
    %40 = vector.shape_cast %39 : vector<1x8x128xf32> to vector<8x128xf32>
    %41 = vector.shape_cast %35 : vector<8x128xf32> to vector<1x8x128xf32>
    tpu.vector_store %arg7[%c0_18, %c0_19, %38], %41 {strides = array<i32>} : memref<1x8x512xf32, #tpu.memory_space<vmem>>, vector<1x8x128xf32>,
    %42 = vector.extract_strided_slice %7 {offsets = [3, 0, 0], sizes = [1, 8, 8], strides = [1, 1, 1]} : vector<4x8x8xf32> to vector<1x8x8xf32>
    %43 = vector.shape_cast %42 : vector<1x8x8xf32> to vector<8x8xf32>
    %44 = vector.extract_strided_slice %6 {offsets = [3, 0, 0], sizes = [1, 8, 128], strides = [1, 1, 1]} : vector<4x8x128xf32> to vector<1x8x128xf32>
    %45 = vector.shape_cast %44 : vector<1x8x128xf32> to vector<8x128xf32>
    %cst_20 = arith.constant dense<0.000000e+00> : vector<8x128xf32>
    %46 = tpu.matmul %43, %45, %cst_20 {dimension_numbers = #tpu.dot_dimension_numbers<[0], [0], [1], [1], [0, 1, 1, 1], [], []>} : vector<8x8xf32>, vector<8x128xf32>, vector<8x128xf32> -> vector<8x128xf32>
    %c384_i32 = arith.constant 384 : i32
    %47 = arith.addi %c384_i32, %8 : i32
    %48 = tpu.assume_multiple %47, 128 : i32
    %c0_21 = arith.constant 0 : index
    %c0_22 = arith.constant 0 : index
    %49 = arith.index_cast %48 : i32 to index
    %50 = vector.load %arg7[%c0_21, %c0_22, %49] : memref<1x8x512xf32, #tpu.memory_space<vmem>>, vector<1x8x128xf32>
    %51 = vector.shape_cast %50 : vector<1x8x128xf32> to vector<8x128xf32>
    %52 = vector.shape_cast %46 : vector<8x128xf32> to vector<1x8x128xf32>
    tpu.vector_store %arg7[%c0_21, %c0_22, %49], %52 {strides = array<i32>} : memref<1x8x512xf32, #tpu.memory_space<vmem>>, vector<1x8x128xf32>,
    return
  }
  func.func @transform_0(%arg0: i32, %arg1: i32, %arg2: i32) -> (i32, i32, i32) {
    %c0_i32 = arith.constant 0 : i32
    %c0_i32_0 = arith.constant 0 : i32
    return %arg0, %c0_i32, %arg1 : i32, i32, i32
  }
  func.func @transform_1(%arg0: i32, %arg1: i32, %arg2: i32) -> (i32, i32, i32) {
    %c0_i32 = arith.constant 0 : i32
    %c0_i32_0 = arith.constant 0 : i32
    return %arg0, %c0_i32, %arg2 : i32, i32, i32
  }
  func.func @transform_2(%arg0: i32, %arg1: i32, %arg2: i32) -> (i32, i32, i32) {
    %c0_i32 = arith.constant 0 : i32
    %c0_i32_0 = arith.constant 0 : i32
    %c0_i32_1 = arith.constant 0 : i32
    %c0_i32_2 = arith.constant 0 : i32
    return %c0_i32, %c0_i32_0, %c0_i32_1 : i32, i32, i32
  }
  func.func @transform_3(%arg0: i32, %arg1: i32, %arg2: i32) -> (i32, i32, i32) {
    %c0_i32 = arith.constant 0 : i32
    %c0_i32_0 = arith.constant 0 : i32
    %c0_i32_1 = arith.constant 0 : i32
    %c0_i32_2 = arith.constant 0 : i32
    return %c0_i32, %c0_i32_0, %c0_i32_1 : i32, i32, i32
  }
  func.func @transform_4(%arg0: i32, %arg1: i32, %arg2: i32) -> (i32, i32, i32) {
    %c0_i32 = arith.constant 0 : i32
    %c0_i32_0 = arith.constant 0 : i32
    return %arg0, %arg1, %c0_i32 : i32, i32, i32
  }
}

</mosaic_0001>

<bundles_post_ra>
// kernel: tpu_custom_call.1
= control target key start
LH: loop header
LB: loop body
LE: loop exit
PB: predicated region body
PF: predicated region fallthrough
CT: control target
= control target key end

     0   :  { %9 = vsyncpa [#allocation4], 0  ;;  %s1694_s0 = inlined_call_operand.vmem [shape: f32[2,32,8], index: 0, kind: input, shape index: {}]   ;;  %s1695_s1 = inlined_call_operand.vmem [shape: f32[2,32,128], index: 1, kind: input, shape index: {}]   ;;  %s1696_s2 = inlined_call_operand.hbm [shape: f32[4,8,32], index: 2, kind: input, shape index: {}]   ;;  %s1697_s3 = inlined_call_operand.hbm [shape: f32[4,8,32], index: 3, kind: input, shape index: {}]   ;;  %s1698_s4 = inlined_call_operand.hbm [shape: f32[2,8,512], index: 4, kind: output, shape index: {}]  }
   0x1   :  { %10 = vsyncpa [#allocation7], 0 }
   0x2   :  { %11 = vsyncpa [#allocation5], 0 }
   0x3   :  { %13 = vsyncpa [#allocation5 + $0x1], 0  ;;  %s1484_s15 = smov 0   ;;  %s1486_s16 = smov 0  }
   0x4   :  { %s1488_s17 = smov 0   ;;  %s1490_s18 = smov 0  }
   0x5   :  { %s1492_s19 = smov 0   ;;  %s1494_s20 = smov 0  }
   0x6 LB: > { %s1103_s21 = sadd.s32 4294967295, %s1450_s20   ;;  %s1104_s22 = sadd.s32 4294967294, %s1450_s20   ;;  %s1450_s20 = sphi %s1494_s20, %s19_s20   ;;  %s1446_s19 = sphi %s1492_s19, %s1716_s19   ;;  %s1442_s18 = sphi %s1490_s18, %s1715_s18   ;;  %s1438_s17 = sphi %s1488_s17, %s1714_s17   ;;  %s1434_s16 = sphi %s1486_s16, %s1713_s16   ;;  %s1430_s15 = sphi %s1484_s15, %s1712_s15  }
   0x7   : > { %s38_s23 = sadd.s32 1, %s1446_s19  ;;  %s145_s24 = sadd.s32 1, %s1438_s17 }
   0x8   : > { %p40_p0 = scmp.ge.s32.totalorder %s38_s23, 2  ;;  %p155_p1 = scmp.ne.s32.totalorder %s1438_s17, %s1434_s16 }
   0x9   : > { %p156_p2 = scmp.eq.s32.totalorder %s1103_s21, 1  ;;  %p161_p3 = scmp.ne.s32.totalorder %s1434_s16, %s1430_s15 }
   0xa   : > { %s1718_s23 = smov (%p40_p0, %s38_s23), 0  ;;  %p162_p5 = scmp.eq.s32.totalorder %s1104_s22, 1 }
   0xb   : > { %p1524_p4 = por %p156_p2, %p155_p1  ;;  %s140_s26 = ssub.s32 %s1446_s19, %s1718_s23 }
   0xc   : > { %p1105_p6 = scmp.ge.s32.totalorder %s1450_s20, 1  ;;  %p143_p7 = scmp.eq.s32.totalorder %s140_s26, 0 }
   0xd   : > { %s1703_s25 = scalar_select %p1524_p4, 1, 0 }
   0xe   : > { %p1531_p8 = por %p162_p5, %p161_p3  ;;  %p169_p9 = scmp.lt.s32.totalorder %s1450_s20, 3 }
   0xf   : > { %s1537_s28 = scalar_select %p143_p7, %s1438_s17, %s145_s24  }
  0x10   : > { %s1704_s27 = scalar_select %p1531_p8, 1, 0 }
  0x11   : > { %p1539_p10 = pnand %p1105_p6, %p169_p9  ;;  %p1543_p11 = scmp.eq.s32.totalorder %s1103_s21, 0 }
  0x12   : > { %s1452_s5 = smov [#allocation3]   ;;  %s1453_s8 = smov [#allocation6]  }
  0x13   : > { %s1705_s29 = scalar_select %p1539_p10, 1, 0 }
  0x14   : > { %s1706_s30 = scalar_select %p1543_p11, 1, 0 }
  0x15   : > { %p1238_p12 = pneg %p1539_p10  ;;  %s181_s6 = sshll.u32 %s1452_s5, 4  ;;  %s182_s6 = int_to_ptr.vmem [resolvable:$true] %s181_s6 }
  0x16   : > { %s194_s9 = sshll.u32 %s1453_s8, 4  ;;  %s1308_s12 = scalar_lea.hbm %s1696_s2, 512  ;;  %s1555_s9 = int_to_ptr.vmem [resolvable:$true] %s194_s9 }
  0x17   : > { %p1551_p13 = pnand %p1543_p11, %p1238_p12  ;;  %p1309_p0 = scmp.ne.s32.totalorder %s1696_s2, %s1308_s12 }
  0x18   : > { %p1315_p5 = scmp.lt.u32.totalorder %s1308_s12, %s1696_s2 }
  0x19   : > { %p1310_p1 = pneg %p1551_p13 }
  0x1b   : > { %p1311_p2 = pnand %p1310_p1, %p1309_p0 }
  0x1d   : > { %p1312_p3 = pneg %p1311_p2 }
  0x1f   : > { %p1317_p6 = pnand %p1315_p5, %p1312_p3 }
  0x21   : > { %1320 = shalt.err (!%p1317_p6)
}
  0x22   : > { %s1321_s24 = scalar_lea.vmem %s182_s6, 512  ;;  %p1329_p8 = scmp.lt.s32.totalorder %s182_s6, %s182_s6 }
  0x23   : > { %p1322_p7 = scmp.ne.s32.totalorder %s182_s6, %s1321_s24  ;;  %p1330_p4 = scmp.lt.s32.totalorder %s1321_s24, %s1321_s24 }
  0x25   : > { %p1324_p9 = pnand %p1322_p7, %p1310_p1  ;;  %p1331_p11 = por %p1330_p4, %p1329_p8 }
  0x27   : > { %p1325_p12 = pneg %p1324_p9 }
  0x29   : > { %p1332_p10 = pnand %p1331_p11, %p1325_p12 }
  0x2b   : > { %1335 = shalt.err (!%p1332_p10)
}
  0x2c   : > { %s1454_s26 = smov 128   ;;  %s1455_s5 = smov 8  }
  0x2d   : > { %1241 = dma.hbm_to_vmem [thread:$0]  (!%p1551_p13), %s1696_s2, 512, %s182_s6, [#allocation4], %s1454_s26, %s1454_s26, %s1455_s5  }
  0x2e   : > { %s1336_s13 = scalar_lea.hbm %s1697_s3, 512 }
  0x2f   : > { %p1337_p0 = scmp.ne.s32.totalorder %s1697_s3, %s1336_s13  ;;  %p1343_p10 = scmp.lt.u32.totalorder %s1336_s13, %s1697_s3 }
  0x31   : > { %p1339_p4 = pnand %p1337_p0, %p1310_p1 }
  0x33   : > { %p1340_p8 = pneg %p1339_p4 }
  0x35   : > { %p1345_p11 = pnand %p1343_p10, %p1340_p8 }
  0x37   : > { %1348 = shalt.err (!%p1345_p11)
}
  0x38   : > { %s1349_s6 = scalar_lea.vmem %s1555_s9, 512  ;;  %p1357_p6 = scmp.lt.s32.totalorder %s1555_s9, %s1555_s9 }
  0x39   : > { %p1350_p2 = scmp.ne.s32.totalorder %s1555_s9, %s1349_s6  ;;  %p1358_p7 = scmp.lt.s32.totalorder %s1349_s6, %s1349_s6 }
  0x3b   : > { %p1352_p3 = pnand %p1350_p2, %p1310_p1  ;;  %p1359_p9 = por %p1358_p7, %p1357_p6 }
  0x3d   : > { %p1353_p5 = pneg %p1352_p3 }
  0x3f   : > { %p1360_p12 = pnand %p1359_p9, %p1353_p5 }
  0x41   : > { %1363 = shalt.err (!%p1360_p12)
}
  0x42   : > { %1244 = dma.hbm_to_vmem [thread:$0]  (!%p1551_p13), %s1697_s3, 512, %s1555_s9, [#allocation7], %s1454_s26, %s1454_s26, %s1455_s5  }
  0x43   : > { %p1708_p0 = scmp.ne.s32.totalorder %s1705_s29, 0 }
  0x44   : > { %p1709_p4 = scmp.ne.s32.totalorder (!%p1708_p0), %s1706_s30, 0 }
  0x45   : > { %232 = sbr.rel (%p1708_p0) target bundleno = 680 (0x2a8), region = 36 }
  0x4c   : > { %1417 = dma.done.wait (%p1709_p4), [#allocation4], 512  }
  0x4d   : > { %1419 = vsyncadd (%p1709_p4), [#allocation4], 4294966784 }
  0x4e   : > { %1421 = dma.done.wait (%p1709_p4), [#allocation7], 512  }
  0x4f   : > { %1423 = vsyncadd (%p1709_p4), [#allocation7], 4294966784  ;;  %p273_p1 = scmp.lt.s32.totalorder %s1442_s18, 1  ;;  %vm301_vm0 = vcmask 261120   ;;  %v293_v5 = vld [vmem:[#allocation3] sm:$0xff]  ;;  %v294_v14 = vld [vmem:[#allocation3 + $0x8] sm:$0xff] }
  0x50   : > { %1172 = vmatprep.mubr.msk.f32.mxu0 %vm301_vm0, %v293_v5  ;;  %v404_v13 = vld [vmem:[#allocation6] sm:$0xff]  ;;  %v295_v15 = vld [vmem:[#allocation3 + $0x10] sm:$0xff]  ;;  %v405_v16 = vld [vmem:[#allocation6 + $0x8] sm:$0xff]  ;;  %v1456_v20 = vmov 0.0   ;;  %vm1457_vm1 = vmmov 0   ;;  %vm399_vm2 = vcmask 64512  }
  0x51   : > { %s274_s7 = scalar_select %p273_p1, %s1442_s18, 1  ;;  %1186 = vmatprep.mubr.msk.f32.mxu1 %vm301_vm0, %v404_v13  ;;  %v296_v17 = vld [vmem:[#allocation3 + $0x18] sm:$0xff]  ;;  %v406_v18 = vld [vmem:[#allocation6 + $0x10] sm:$0xff] }
  0x52   : > { %v407_v19 = vld [vmem:[#allocation6 + $0x18] sm:$0xff]  ;;  %s270_s30 = sand.u32 1, %s1434_s16   ;;  %s1139_s24 = sshll.u32 %s1442_s18, 9 }
  0x53   : > { %s1137_s9 = sshll.u32 %s274_s7, 5  ;;  %s1112_s14 = sshll.u32 %s270_s30, 5 }
  0x54   : > { %s280_s5 = scalar_lea.vmem %s1694_s0, %s1137_s9  ;;  %s288_s13 = scalar_lea.vmem %s1695_s1, %s1137_s9 }
  0x55   : > { %v297_v0 = vld [vmem:[%s280_s5] sm:$0xff]  ;;  %v298_v1 = vld [vmem:[%s280_s5 + $0x8] sm:$0xff]  ;;  %v299_v2 = vld [vmem:[%s280_s5 + $0x10] sm:$0xff]  ;;  %s272_s21 = scalar_lea.vmem [#allocation8], %s1112_s14  ;;  %s1649_s10 = scalar_lea.hbm %s1698_s4, %s1139_s24 }
  0x56   : > { %v1212_v3 = vpack.c.bf16 %v298_v1, %v297_v0  ;;  %v300_v4 = vld [vmem:[%s280_s5 + $0x18] sm:$0xff]  ;;  %v408_v7 = vld [vmem:[%s288_s13] sm:$0xff]  ;;  %v409_v8 = vld [vmem:[%s288_s13 + $0x8] sm:$0xff]  ;;  %s976_s22 = sshll.u32 %s272_s21, 4  ;;  %s960_s7 = scalar_lea.sflag [#allocation5], %s270_s30  ;;  %s1644_s22 = int_to_ptr.vmem [resolvable:$true] %s976_s22 }
  0x57   : > { %v1216_v6 = vpack.c.bf16 %v300_v4, %v299_v2  ;;  %v410_v9 = vld [vmem:[%s288_s13 + $0x10] sm:$0xff]  ;;  %v411_v10 = vld [vmem:[%s288_s13 + $0x18] sm:$0xff]  ;;  %v1220_v11 = vpack.c.bf16 %v409_v8, %v408_v7  ;;  %s1364_s9 = scalar_lea.vmem %s1644_s22, 512  ;;  %p1710_p8 = scmp.ne.s32.totalorder %s1703_s25, 0 }
  0x58   : > { %1213 = vmatprep.subr.bf16.mxu0 %v1212_v3  ;;  %v1224_v12 = vpack.c.bf16 %v411_v10, %v410_v9  ;;  %p1365_p13 = scmp.ne.s32.totalorder %s1644_s22, %s1364_s9  ;;  %s1458_s18 = smov [#allocation8]  }
  0x59   : > { %1215 = vmatpush3.bf16.msra.mxu0 %v1212_v3  ;;  %1221 = vmatprep.subr.bf16.mxu1 %v1220_v11  ;;  %s1368_s26 = sshll.u32 %s1458_s18, 4  ;;  %s1369_s26 = int_to_ptr.vmem [resolvable:$false] %s1368_s26 }
  0x5a   : > { %1217 = vmatprep.subr.bf16.mxu0 %v1216_v6  ;;  %1223 = vmatpush3.bf16.msra.mxu1 %v1220_v11  ;;  %p1366_p10 = pnand %p1365_p13, %p1710_p8  ;;  %s1370_s29 = scalar_lea.vmem %s1369_s26, 1024 }
  0x5b   : > { %1225 = vmatprep.subr.bf16.mxu1 %v1224_v12  ;;  %p1371_p2 = scmp.lt.s32.totalorder %s1644_s22, %s1369_s26  ;;  %p1372_p3 = scmp.lt.s32.totalorder %s1370_s29, %s1364_s9 }
  0x5c   : > { %p1367_p11 = pneg %p1366_p10 }
  0x5d   : > { %1219 = vmatpush3.bf16.msra.mxu0 %v1216_v6  ;;  %p1373_p5 = por %p1372_p3, %p1371_p2 }
  0x5e   : > { %1227 = vmatpush3.bf16.msra.mxu1 %v1224_v12  ;;  %1192 = vmatprep.subr.mxu0 %v1456_v20 }
  0x5f   : > { %1197 = vmatprep.subr.mxu1 %v1456_v20  ;;  %p1374_p6 = pnand %p1373_p5, %p1367_p11 }
  0x60   : > { %1173 = vmatmul.mubr.msk.f32.vlgmr.msra.gmra.mrb[0].mxu0 %vm301_vm0, %v294_v14 }
  0x61   : > { %1175 = vmatprep.mubr.msk.f32.mxu0 %vm301_vm0, %v295_v15  ;;  %1187 = vmatmul.mubr.msk.f32.vlgmr.msra.gmra.mrb[0].mxu1 %vm301_vm0, %v405_v16 }
  0x62   : > { %1189 = vmatprep.mubr.msk.f32.mxu1 %vm301_vm0, %v406_v18 }
  0x64   : > { %1176 = vmatmul.mubr.msk.f32.gmra.mrb[2].mxu0 %vm301_vm0, %v296_v17 }
  0x65   : > { %1190 = vmatmul.mubr.msk.f32.gmra.mrb[2].mxu1 %vm301_vm0, %v407_v19  ;;  %1194 = vmatprep.mubr.msk.f32.mxu0 %vm1457_vm1, %v1456_v20 }
  0x66   : > { %1199 = vmatprep.mubr.msk.f32.mxu1 %vm1457_vm1, %v1456_v20 }
 0x133   : > { %v1174_v21 = vpop.f32.mrb[0].mxu0 }
 0x134   : > { %401 = vst.msk [vmem:[#allocation2 + $0x8] sm:$0xff] %vm399_vm2, %v1174_v21  ;;  %v380_v22 = vpop.f32.mrb[1].mxu0  ;;  %v1188_v23 = vpop.f32.mrb[0].mxu1 }
 0x135   : > { %400 = vst.msk [vmem:[#allocation2] sm:$0xff] %vm399_vm2, %v380_v22  ;;  %v491_v25 = vpop.f32.mrb[1].mxu1  ;;  %1198 = vmatpush3.msra.mxu1 %v1188_v23 }
 0x136   : > { %1193 = vmatpush3.msra.mxu0 %v491_v25  ;;  %1207 = vmatprep.subr.mxu1 %v1456_v20 }
 0x137   : > { %v1177_v24 = vpop.f32.mrb[2].mxu0  ;;  %1202 = vmatprep.subr.mxu0 %v1456_v20 }
 0x138   : > { %403 = vst.msk [vmem:[#allocation2 + $0x18] sm:$0xff] %vm399_vm2, %v1177_v24  ;;  %v390_v26 = vpop.f32.mrb[3].mxu0  ;;  %v1191_v28 = vpop.f32.mrb[2].mxu1 }
 0x139   : > { %402 = vst.msk [vmem:[#allocation2 + $0x10] sm:$0xff] %vm399_vm2, %v390_v26  ;;  %v501_v29 = vpop.f32.mrb[3].mxu1 }
 0x13b   : > { %v511_v30 = vld [vmem:[#allocation2 + $0x8] sm:$0xff] }
 0x13c   : > { %v510_v27 = vld [vmem:[#allocation2] sm:$0xff] }
 0x13d   : > { %515 = vxpose.xlu0.b32.start.end [1/1] (short) (narrow) %v510_v27, 8 }
 0x13f   : > { %v513_v32 = vld [vmem:[#allocation2 + $0x18] sm:$0xff] }
 0x140   : > { %v512_v31 = vld [vmem:[#allocation2 + $0x10] sm:$0xff] }
 0x141   : > { %626 = vxpose.xlu0.b32.start.end [1/1] (short) (narrow) %v511_v30, 8  ;;  %737 = vxpose.xlu1.b32.start.end [1/1] (short) (narrow) %v512_v31, 8 }
 0x145   : > { %848 = vxpose.xlu1.b32.start.end [1/1] (short) (narrow) %v513_v32, 8 }
 0x1bd   : > { %v531_v33 = vpop.trf.xlu0 }
 0x1be   : > { %1195 = vmatmul.mubr.msk.f32.vlgmr.msra.gmra.mrb[4].mxu0 %vm399_vm2, %v531_v33 }
 0x1bf   : > { %1203 = vmatpush3.msra.mxu0 %v501_v29  ;;  %1204 = vmatprep.mubr.msk.f32.mxu0 %vm1457_vm1, %v1456_v20 }
 0x1c1   : > { %v642_v34 = vpop.trf.xlu0  ;;  %v753_v35 = vpop.trf.xlu1 }
 0x1c2   : > { %1200 = vmatmul.mubr.msk.f32.vlgmr.msra.gmra.mrb[4].mxu1 %vm399_vm2, %v642_v34  ;;  %1205 = vmatmul.mubr.msk.f32.vlgmr.msra.gmra.mrb[6].mxu0 %vm399_vm2, %v753_v35 }
 0x1c3   : > { %1208 = vmatpush3.msra.mxu1 %v1191_v28  ;;  %1209 = vmatprep.mubr.msk.f32.mxu1 %vm1457_vm1, %v1456_v20 }
 0x1c5   : > { %v864_v36 = vpop.trf.xlu1 }
 0x1c6   : > { %1210 = vmatmul.mubr.msk.f32.vlgmr.msra.gmra.mrb[6].mxu1 %vm399_vm2, %v864_v36 }
 0x291   : > { %v617_v37 = vpop.f32.mrb[4].mxu0 }
 0x292   : > { %625 = vst [vmem:[%s272_s21] sm:$0xff] %v617_v37  ;;  %v1196_v38 = vpop.f32.mrb[5].mxu0 }
 0x295   : > { %v727_v39 = vpop.f32.mrb[4].mxu1  ;;  %v838_v40 = vpop.f32.mrb[6].mxu0 }
 0x296   : > { %1127 = vst [vmem:[%s272_s21 + $0x8] sm:$0xff] %v727_v39  ;;  %1129 = vst [vmem:[%s272_s21 + $0x10] sm:$0xff] %v838_v40  ;;  %v1201_v41 = vpop.f32.mrb[5].mxu1  ;;  %v1206_v42 = vpop.f32.mrb[7].mxu0 }
 0x299   : > { %v949_v43 = vpop.f32.mrb[6].mxu1 }
 0x29a   : > { %1131 = vst [vmem:[%s272_s21 + $0x18] sm:$0xff] %v949_v43  ;;  %v1211_v44 = vpop.f32.mrb[7].mxu1 }
 0x29b   : > { %1377 = shalt.err (!%p1374_p6)
}
 0x29c   : > { %s1378_s5 = scalar_lea.hbm %s1649_s10, 512  ;;  %s1382_s13 = scalar_lea.hbm %s1698_s4, 1024 }
 0x29d   : > { %p1379_p7 = scmp.ne.s32.totalorder %s1649_s10, %s1378_s5  ;;  %p1383_p0 = scmp.lt.u32.totalorder %s1649_s10, %s1698_s4 }
 0x29e   : > { %p1384_p4 = scmp.lt.u32.totalorder %s1382_s13, %s1378_s5  ;;  %p1386_p13 = scmp.lt.u32.totalorder %s1378_s5, %s1649_s10 }
 0x29f   : > { %p1380_p9 = pnand %p1379_p7, %p1710_p8 }
 0x2a0   : > { %p1385_p1 = por %p1384_p4, %p1383_p0 }
 0x2a1   : > { %p1381_p12 = pneg %p1380_p9 }
 0x2a2   : > { %p1387_p10 = por %p1386_p13, %p1385_p1 }
 0x2a4   : > { %p1388_p11 = pnand %p1387_p10, %p1381_p12 }
 0x2a6   : > { %1391 = shalt.err (!%p1388_p11)
}
 0x2a7   : > { %1236 = dma.vmem_to_hbm [thread:$0]  (%p1710_p8), %s1644_s22, 512, %s1649_s10, %s960_s7  }
 0x2a8 PF: > { %p1253_p2 = scmp.ge.s32.totalorder %s1450_s20, 2  ;;  %s988_s21 = sand.u32 1, %s1430_s15  }
 0x2a9   : > { %p1711_p3 = scmp.ne.s32.totalorder %s1704_s27, 0  ;;  %s989_s24 = scalar_lea.sflag [#allocation5], %s988_s21 }
 0x2ab   : > { %p1246_p5 = pnand %p1253_p2, %p1711_p3 }
 0x2ad   : > { %1425 = dma.done.wait (!%p1246_p5), %s989_s24, 512  }
 0x2ae   : > { %1427 = vsyncadd (!%p1246_p5), %s989_s24, 4294966784  ;;  %s19_s20 = sadd.s32 1, %s1450_s20   ;;  %s1712_s15 = smov %s1434_s16 }
 0x2af   : > { %p16_p6 = scmp.ge.s32.totalorder %s19_s20, 4   ;;  %s1713_s16 = smov %s1438_s17 }
 0x2b0   : > { %s1714_s17 = smov %s1537_s28  ;;  %s1715_s18 = smov %s1446_s19 }
 0x2b1   : > { %s1716_s19 = smov %s1718_s23  ;;  %18 = sbr.rel (!%p16_p6) target bundleno = 6 (0x6), region = 91 }
 0x2b8   :  { %994 = vsyncpa [#allocation4], 1 }
 0x2b9   :  { %996 = vsyncpa [#allocation4 + $0x1], 1 }
 0x2ba   :  { %997 = vsyncpa [#allocation7], 1 }
 0x2bb   :  { %998 = vsyncpa [#allocation5], 1 }
 0x2bc   :  { %1000 = vsyncpa [#allocation5 + $0x1], 1 }

</bundles_post_ra>
